<compile_context>
chip_gen: v6e
topology: v6e:2x2x1
jax: 0.10.0
libtpu: 0.0.40
codegen_flags: <defaults>
</compile_context>

<pallas_src>
import functools

import jax
import jax.numpy as jnp
from jax.experimental import pallas as pl
from jax.experimental.pallas import tpu as pltpu

_HIDDEN = 512
_LANE = 128
_DEFAULT_TILE_B = 1024
_MIN_PALLAS_BATCH = 64   # below this, plain XLA fusion is strictly faster


def _round_up(n, m):
    return ((n + m - 1) // m) * m


def _default_bf16_epilogue():
    # v5e's VPU has no bf16 path -> keep the layer-1 epilogue in f32 there.
    try:
        kind = jax.devices()[0].device_kind.lower()
        return "v5" not in kind
    except Exception:
        return True


def _pinned_spec(shape):
    """BlockSpec for an operand that stays VMEM-resident across all grid steps.

    The index_map is constant, so a second pipeline buffer is dead weight;
    request single-buffering (graceful fallback if the kwarg is unsupported).
    """
    try:
        return pl.BlockSpec(shape, lambda i: (0, 0), pipeline_mode=pl.Buffered(1))
    except TypeError:
        return pl.BlockSpec(shape, lambda i: (0, 0))


def _state_encoder_kernel(x_ref, w1_ref, b1_ref, w2_ref, b2_ref, o_ref):
    # Fused MLP hot path; all operands already in VMEM.
    # bf16 x bf16 -> f32 on the MXU. Layer-1 epilogue runs in b1's dtype:
    # f32 on v5e, bf16 on v6e/v7x (halves hidden-tile VMEM traffic).
    x = x_ref[...].astype(jnp.bfloat16)                                # in-kernel cast
    h = jnp.dot(x, w1_ref[...], preferred_element_type=jnp.float32)    # (TB, H) f32
    b1 = b1_ref[...]
    h = jnp.maximum(h.astype(b1.dtype) + b1, 0.0)                      # bias + ReLU
    y = jnp.dot(h.astype(jnp.bfloat16), w2_ref[...],
                preferred_element_type=jnp.float32)                     # (TB, Dout_p) f32
    o_ref[...] = (y + b2_ref[...]).astype(o_ref.dtype)


def _choose_tiling(B, d_in_p, d_out_p, x_itemsize, out_itemsize, hid_itemsize):
    """Batch tile: big enough to amortize ~0.35us/step overhead, small enough to
    keep the per-step footprint comfortable on v7x (64 MiB/TC), and >= 2 grid
    steps for non-tiny B so both v7x TensorCores get batch tiles."""
    tile = _DEFAULT_TILE_B
    per_row = (2 * d_in_p * x_itemsize          # x tile, double-buffered
               + 2 * d_out_p * out_itemsize     # out tile, double-buffered
               + _HIDDEN * hid_itemsize)        # hidden activation temp
    while tile > 128 and tile * per_row > (24 << 20):
        tile //= 2
    if B >= 32:
        n = max(2, pl.cdiv(B, tile))
        tb = _round_up(pl.cdiv(B, n), 16)
    else:
        tb = _round_up(B, 16)                   # tiny batch: single step
    b_p = _round_up(B, tb)
    return tb, b_p, b_p // tb


@functools.partial(jax.jit,
                   static_argnames=("out_dtype", "force_pallas", "bf16_epilogue"))
def state_encoder_forward(x, w1, b1, w2, b2, *, out_dtype=None,
                          force_pallas=False, bf16_epilogue=None):
    """Pallas implementation of StateEncoder.forward.

    x : (B, D_in) or (D_in,) float32
    w1: (D_in, 512), b1: (512,)
    w2: (512, D_out), b2: (D_out,)
    Returns (B, D_out) in out_dtype (default: x's dtype); f32 MXU accumulation.
    """
    # PyTorch forward's reshape glue: 1-D -> (1, D_in); N-D -> (-1, x.shape[1]).
    x2 = x.reshape(1, -1) if x.ndim == 1 else x.reshape(-1, x.shape[1])

    B, d_in = x2.shape
    hidden = w1.shape[1]
    d_out = w2.shape[1]
    if out_dtype is None:
        out_dtype = x2.dtype
    if bf16_epilogue is None:
        bf16_epilogue = _default_bf16_epilogue()

    # Tiny-batch path: fixed grid overhead + padded weight DMA dominates -> XLA fusion.
    if B < _MIN_PALLAS_BATCH and not force_pallas:
        h = jnp.maximum(jnp.dot(x2, w1) + b1, 0.0)
        return (jnp.dot(h, w2) + b2).astype(out_dtype)

    d_in_p = _round_up(d_in, _LANE)
    d_out_p = _round_up(d_out, _LANE)
    out_itemsize = jnp.dtype(out_dtype).itemsize
    hid_itemsize = 2 if bf16_epilogue else 4

    tb, b_p, n_tiles = _choose_tiling(B, d_in_p, d_out_p, x2.dtype.itemsize,
                                      out_itemsize, hid_itemsize)

    # x: skip the wrapper pad/cast copy when no padding is needed (in-kernel cast).
    if d_in_p == d_in and b_p == B:
        x_in = x2
    else:
        x_in = jnp.zeros((b_p, d_in_p), jnp.bfloat16).at[:B, :d_in].set(
            x2.astype(jnp.bfloat16))

    # Weights/biases: cast once at the boundary; pad feature dims only if needed.
    w1_p = w1.astype(jnp.bfloat16)
    if d_in_p != d_in:
        w1_p = jnp.zeros((d_in_p, hidden), jnp.bfloat16).at[:d_in, :].set(w1_p)
    b1_p = b1.reshape(1, hidden).astype(jnp.bfloat16 if bf16_epilogue else jnp.float32)
    w2_p = w2.astype(jnp.bfloat16)
    b2_p = b2.reshape(1, d_out).astype(jnp.float32)
    if d_out_p != d_out:
        w2_p = jnp.zeros((hidden, d_out_p), jnp.bfloat16).at[:, :d_out].set(w2_p)
        b2_p = jnp.zeros((1, d_out_p), jnp.float32).at[:, :d_out].set(b2_p)

    # Explicit VMEM limit from the actual per-step footprint (+ slack).
    x_in_itemsize = jnp.dtype(x_in.dtype).itemsize
    step_bytes = (2 * tb * d_in_p * x_in_itemsize             # x, double-buffered
                  + 2 * tb * d_out_p * out_itemsize           # out, double-buffered
                  + 2 * (d_in_p * hidden + hidden * d_out_p)  # bf16 weights (1 buffer)
                  + tb * hidden * hid_itemsize                # hidden temp
                  + 4 * (hidden + d_out_p))                   # biases
    vmem_limit = max(16 << 20, min(2 * step_bytes + (2 << 20), 48 << 20))

    cost = pl.CostEstimate(
        flops=2 * b_p * d_in_p * hidden + 2 * b_p * hidden * d_out_p,
        transcendentals=0,
        bytes_accessed=(x_in.size * x_in_itemsize + w1_p.size * 2 + w2_p.size * 2
                        + b1_p.size * b1_p.dtype.itemsize + b2_p.size * 4
                        + b_p * d_out_p * out_itemsize),
    )

    out_p = pl.pallas_call(
        _state_encoder_kernel,
        out_shape=jax.ShapeDtypeStruct((b_p, d_out_p), out_dtype),
        grid_spec=pl.GridSpec(
            grid=(n_tiles,),
            in_specs=[
                pl.BlockSpec((tb, d_in_p), lambda i: (i, 0)),   # x: tiled over batch
                _pinned_spec((d_in_p, hidden)),                 # W1: VMEM-resident
                _pinned_spec((1, hidden)),                      # b1
                _pinned_spec((hidden, d_out_p)),                # W2
                _pinned_spec((1, d_out_p)),                     # b2
            ],
            out_specs=pl.BlockSpec((tb, d_out_p), lambda i: (i, 0)),
        ),
        compiler_params=pltpu.CompilerParams(
            dimension_semantics=("parallel",),     # batch tiles -> both TCs on v7x
            vmem_limit_bytes=int(vmem_limit),
        ),
        cost_estimate=cost,
    )(x_in, w1_p, b1_p, w2_p, b2_p)

    if b_p == B and d_out_p == d_out:
        return out_p                       # no unpad copy needed
    return out_p[:B, :d_out]


def init_params(key, input_state_dim, img_enc_dim, hidden=_HIDDEN):
    """Deterministic synthetic init matching nn.Linear shapes (stored transposed)."""
    k1, k2, k3, k4 = jax.random.split(key, 4)
    bound1 = 1.0 / jnp.sqrt(input_state_dim * 1.0)
    bound2 = 1.0 / jnp.sqrt(hidden * 1.0)
    w1 = jax.random.uniform(k1, (input_state_dim, hidden), jnp.float32, -bound1, bound1)
    b1 = jax.random.uniform(k2, (hidden,), jnp.float32, -bound1, bound1)
    w2 = jax.random.uniform(k3, (hidden, img_enc_dim), jnp.float32, -bound2, bound2)
    b2 = jax.random.uniform(k4, (img_enc_dim,), jnp.float32, -bound2, bound2)
    return w1, b1, w2, b2


def _reference(x, w1, b1, w2, b2, bf16_epilogue):
    """Reference with numerics matched to the kernel (bf16 MXU operands, f32 acc)."""
    xb = x.astype(jnp.bfloat16)
    h = jnp.dot(xb, w1.astype(jnp.bfloat16), preferred_element_type=jnp.float32)
    if bf16_epilogue:
        h = jnp.maximum(h.astype(jnp.bfloat16) + b1.astype(jnp.bfloat16), 0.0)
    else:
        h = jnp.maximum(h + b1, 0.0)
    y = jnp.dot(h.astype(jnp.bfloat16), w2.astype(jnp.bfloat16),
                preferred_element_type=jnp.float32)
    return y + b2


if __name__ == "__main__":
    key = jax.random.PRNGKey(0)
    k_param, k_x1, k_param2, k_x2 = jax.random.split(key, 4)

    epi = _default_bf16_epilogue()

    # --- Test 1: tiny module shapes (forces the Pallas path; exercises padding) ---
    batch, d_in, d_out = 2, 32, 32
    w1, b1, w2, b2 = init_params(k_param, d_in, d_out)
    x = jax.random.normal(k_x1, (batch, d_in), jnp.float32)

    y = state_encoder_forward(x, w1, b1, w2, b2, force_pallas=True)
    jax.block_until_ready(y)
    assert y.shape == (batch, d_out)

    ref_m = _reference(x, w1, b1, w2, b2, epi)
    assert jnp.allclose(y, ref_m, atol=5e-3, rtol=5e-3)
    ref_f32 = jnp.maximum(x @ w1 + b1, 0.0) @ w2 + b2
    assert jnp.allclose(y, ref_f32, atol=5e-2, rtol=5e-2)

    # 1-D input path (matches PyTorch's x.view(-1, len(x))).
    y1 = state_encoder_forward(x[0], w1, b1, w2, b2, force_pallas=True)
    jax.block_until_ready(y1)
    assert y1.shape == (1, d_out)
    assert jnp.allclose(y1, ref_m[:1], atol=5e-3, rtol=5e-3)

    # --- Test 2: lane-aligned dims, multi-tile grid (no-copy x / no-unpad fast path) ---
    batch2, d_in2, d_out2 = 256, 128, 128
    w1b, b1b, w2b, b2b = init_params(k_param2, d_in2, d_out2)
    x2 = jax.random.normal(k_x2, (batch2, d_in2), jnp.float32)

    y2 = state_encoder_forward(x2, w1b, b1b, w2b, b2b)
    jax.block_until_ready(y2)
    assert y2.shape == (batch2, d_out2)
    ref2 = _reference(x2, w1b, b1b, w2b, b2b, epi)
    assert jnp.allclose(y2, ref2, atol=5e-3, rtol=5e-3)

    print("KERNEL_OK")
</pallas_src>

<mosaic_0001>
module attributes {stable_mosaic.version = 11 : i64} {
  func.func @_state_encoder_kernel(%arg0: i32, %arg1: memref<16x128xbf16, #tpu.memory_space<vmem>>, %arg2: memref<128x512xbf16, #tpu.memory_space<vmem>>, %arg3: memref<1x512xbf16, #tpu.memory_space<vmem>>, %arg4: memref<512x128xbf16, #tpu.memory_space<vmem>>, %arg5: memref<1x128xf32, #tpu.memory_space<vmem>>, %arg6: memref<16x128xf32, #tpu.memory_space<vmem>>) attributes {dimension_semantics = [#tpu.dimension_semantics<parallel>], iteration_bounds = array<i64: 1>, scalar_prefetch = 0 : i64, scratch_operands = 0 : i64, tpu.core_type = #tpu.core_type<tc>, window_params = [{transform_indices = @transform_0, window_bounds = array<i64: 16, 128>}, {pipeline_mode = #tpu.pipeline_mode<synchronous>, transform_indices = @transform_1, window_bounds = array<i64: 128, 512>}, {pipeline_mode = #tpu.pipeline_mode<synchronous>, transform_indices = @transform_2, window_bounds = array<i64: 1, 512>}, {pipeline_mode = #tpu.pipeline_mode<synchronous>, transform_indices = @transform_3, window_bounds = array<i64: 512, 128>}, {pipeline_mode = #tpu.pipeline_mode<synchronous>, transform_indices = @transform_4, window_bounds = array<i64: 1, 128>}, {transform_indices = @transform_5, window_bounds = array<i64: 16, 128>}]} {
    %c0 = arith.constant 0 : index
    %c0_0 = arith.constant 0 : index
    %0 = vector.load %arg1[%c0, %c0_0] : memref<16x128xbf16, #tpu.memory_space<vmem>>, vector<16x128xbf16>
    %c0_1 = arith.constant 0 : index
    %c0_2 = arith.constant 0 : index
    %1 = vector.load %arg2[%c0_1, %c0_2] : memref<128x512xbf16, #tpu.memory_space<vmem>>, vector<128x512xbf16>
    %cst = arith.constant dense<0.000000e+00> : vector<16x512xf32>
    %2 = tpu.matmul %0, %1, %cst {dimension_numbers = #tpu.dot_dimension_numbers<[1], [0], [0], [1], [0, 0, 1, 1], [], []>} : vector<16x128xbf16>, vector<128x512xbf16>, vector<16x512xf32> -> vector<16x512xf32>
    %c0_3 = arith.constant 0 : index
    %c0_4 = arith.constant 0 : index
    %3 = vector.load %arg3[%c0_3, %c0_4] : memref<1x512xbf16, #tpu.memory_space<vmem>>, vector<1x512xbf16>
    %4 = arith.truncf %2 : vector<16x512xf32> to vector<16x512xbf16>
    %5 = vector.broadcast %3 : vector<1x512xbf16> to vector<16x512xbf16>
    %6 = arith.addf %4, %5 : vector<16x512xbf16>
    %cst_5 = arith.constant 0.000000e+00 : bf16
    %7 = vector.broadcast %cst_5 : bf16 to vector<16x512xbf16>
    %8 = arith.maximumf %6, %7 : vector<16x512xbf16>
    %c0_6 = arith.constant 0 : index
    %c0_7 = arith.constant 0 : index
    %9 = vector.load %arg4[%c0_6, %c0_7] : memref<512x128xbf16, #tpu.memory_space<vmem>>, vector<512x128xbf16>
    %cst_8 = arith.constant dense<0.000000e+00> : vector<16x128xf32>
    %10 = tpu.matmul %8, %9, %cst_8 {dimension_numbers = #tpu.dot_dimension_numbers<[1], [0], [0], [1], [0, 0, 1, 1], [], []>} : vector<16x512xbf16>, vector<512x128xbf16>, vector<16x128xf32> -> vector<16x128xf32>
    %c0_9 = arith.constant 0 : index
    %c0_10 = arith.constant 0 : index
    %11 = vector.load %arg5[%c0_9, %c0_10] : memref<1x128xf32, #tpu.memory_space<vmem>>, vector<1x128xf32>
    %12 = vector.broadcast %11 : vector<1x128xf32> to vector<16x128xf32>
    %13 = arith.addf %10, %12 : vector<16x128xf32>
    %c0_11 = arith.constant 0 : index
    %c0_12 = arith.constant 0 : index
    %14 = vector.load %arg6[%c0_11, %c0_12] : memref<16x128xf32, #tpu.memory_space<vmem>>, vector<16x128xf32>
    tpu.vector_store %arg6[%c0_11, %c0_12], %13 {strides = array<i32>} : memref<16x128xf32, #tpu.memory_space<vmem>>, vector<16x128xf32>,
    return
  }
  func.func @transform_0(%arg0: i32) -> (i32, i32) {
    %c0_i32 = arith.constant 0 : i32
    %c0_i32_0 = arith.constant 0 : i32
    return %arg0, %c0_i32 : i32, i32
  }
  func.func @transform_1(%arg0: i32) -> (i32, i32) {
    %c0_i32 = arith.constant 0 : i32
    %c0_i32_0 = arith.constant 0 : i32
    %c0_i32_1 = arith.constant 0 : i32
    return %c0_i32, %c0_i32_0 : i32, i32
  }
  func.func @transform_2(%arg0: i32) -> (i32, i32) {
    %c0_i32 = arith.constant 0 : i32
    %c0_i32_0 = arith.constant 0 : i32
    %c0_i32_1 = arith.constant 0 : i32
    return %c0_i32, %c0_i32_0 : i32, i32
  }
  func.func @transform_3(%arg0: i32) -> (i32, i32) {
    %c0_i32 = arith.constant 0 : i32
    %c0_i32_0 = arith.constant 0 : i32
    %c0_i32_1 = arith.constant 0 : i32
    return %c0_i32, %c0_i32_0 : i32, i32
  }
  func.func @transform_4(%arg0: i32) -> (i32, i32) {
    %c0_i32 = arith.constant 0 : i32
    %c0_i32_0 = arith.constant 0 : i32
    %c0_i32_1 = arith.constant 0 : i32
    return %c0_i32, %c0_i32_0 : i32, i32
  }
  func.func @transform_5(%arg0: i32) -> (i32, i32) {
    %c0_i32 = arith.constant 0 : i32
    %c0_i32_0 = arith.constant 0 : i32
    return %arg0, %c0_i32 : i32, i32
  }
}

</mosaic_0001>

<bundles_post_ra>
// kernel: state_encoder_forward.1
= control target key start
LH: loop header
LB: loop body
LE: loop exit
PB: predicated region body
PF: predicated region fallthrough
CT: control target
= control target key end

     0   :  { %v918_v1 = vmov 0   ;;  %s1163_s1 = inlined_call_operand.vmem [shape: bf16[128,512], index: 1, kind: input, shape index: {}]   ;;  %s1164_s0 = inlined_call_operand.vmem [shape: bf16[16,128], index: 0, kind: input, shape index: {}]   ;;  %s1165_s3 = inlined_call_operand.vmem [shape: bf16[512,128], index: 3, kind: input, shape index: {}]   ;;  %s1166_s2 = inlined_call_operand.vmem [shape: bf16[1,512], index: 2, kind: input, shape index: {}]   ;;  %s1167_s4 = inlined_call_operand.vmem [shape: f32[1,128], index: 4, kind: input, shape index: {}]   ;;  %s1168_s5 = inlined_call_operand.vmem [shape: f32[16,128], index: 5, kind: output, shape index: {}]  }
   0x1   :  { %v837_v0 = vld [vmem:[%s1163_s1 + $0xe4] ss:$16 sps:$4 sm:$0xff]   ;;  %253 = vmatprep.mubr.bf16.mxu0 %v918_v1  ;;  %296 = vmatprep.mubr.bf16.mxu1 %v918_v1  ;;  %v839_v2 = vld [vmem:[%s1163_s1 + $0xec] ss:$16 sps:$4 sm:$0xff]   ;;  %v841_v3 = vld [vmem:[%s1163_s1 + $0xe0] ss:$16 sps:$4 sm:$0xff]  }
   0x2   :  { %221 = vmatprep.subr.bf16.mxu0 %v837_v0  ;;  %v842_v4 = vld [vmem:[%s1163_s1 + $0xe8] ss:$16 sps:$4 sm:$0xff]   ;;  %264 = vmatprep.subr.bf16.mxu1 %v839_v2  ;;  %v843_v5 = vld [vmem:[%s1163_s1 + $0xc4] ss:$16 sps:$4 sm:$0xff]   ;;  %v845_v6 = vld [vmem:[%s1163_s1 + $0xcc] ss:$16 sps:$4 sm:$0xff]  }
   0x3   :  { %222 = vmatpush1.bf16.msra.mxu0 %v841_v3  ;;  %265 = vmatpush1.bf16.msra.mxu1 %v842_v4  ;;  %v847_v7 = vld [vmem:[%s1163_s1 + $0xc0] ss:$16 sps:$4 sm:$0xff]   ;;  %v848_v8 = vld [vmem:[%s1163_s1 + $0xc8] ss:$16 sps:$4 sm:$0xff]   ;;  %v849_v9 = vld [vmem:[%s1163_s1 + $0xa4] ss:$16 sps:$4 sm:$0xff]  }
   0x4   :  { %223 = vmatprep.subr.bf16.mxu0 %v843_v5  ;;  %266 = vmatprep.subr.bf16.mxu1 %v845_v6  ;;  %v851_v10 = vld [vmem:[%s1163_s1 + $0xac] ss:$16 sps:$4 sm:$0xff]   ;;  %v853_v11 = vld [vmem:[%s1163_s1 + $0xa0] ss:$16 sps:$4 sm:$0xff]   ;;  %v854_v12 = vld [vmem:[%s1163_s1 + $0xa8] ss:$16 sps:$4 sm:$0xff]   ;;  %v324_v5 = vlaneseq }
   0x5   :  { %v855_v13 = vld [vmem:[%s1163_s1 + $0x84] ss:$16 sps:$4 sm:$0xff]   ;;  %v857_v14 = vld [vmem:[%s1163_s1 + $0x8c] ss:$16 sps:$4 sm:$0xff]   ;;  %v859_v15 = vld [vmem:[%s1163_s1 + $0x80] ss:$16 sps:$4 sm:$0xff]  }
   0x6   :  { %v860_v16 = vld [vmem:[%s1163_s1 + $0x88] ss:$16 sps:$4 sm:$0xff]   ;;  %v861_v17 = vld [vmem:[%s1163_s1 + $0x64] ss:$16 sps:$4 sm:$0xff]   ;;  %v863_v18 = vld [vmem:[%s1163_s1 + $0x6c] ss:$16 sps:$4 sm:$0xff]  }
   0x7   :  { %224 = vmatpush1.bf16.msra.mxu0 %v847_v7  ;;  %267 = vmatpush1.bf16.msra.mxu1 %v848_v8  ;;  %v865_v19 = vld [vmem:[%s1163_s1 + $0x60] ss:$16 sps:$4 sm:$0xff]   ;;  %v866_v20 = vld [vmem:[%s1163_s1 + $0x68] ss:$16 sps:$4 sm:$0xff]   ;;  %v867_v21 = vld [vmem:[%s1163_s1 + $0x44] ss:$16 sps:$4 sm:$0xff]  }
   0x8   :  { %225 = vmatprep.subr.bf16.mxu0 %v849_v9  ;;  %268 = vmatprep.subr.bf16.mxu1 %v851_v10  ;;  %v869_v22 = vld [vmem:[%s1163_s1 + $0x4c] ss:$16 sps:$4 sm:$0xff]   ;;  %v871_v23 = vld [vmem:[%s1163_s1 + $0x40] ss:$16 sps:$4 sm:$0xff]   ;;  %v872_v24 = vld [vmem:[%s1163_s1 + $0x48] ss:$16 sps:$4 sm:$0xff]  }
   0x9   :  { %v873_v25 = vld [vmem:[%s1163_s1 + $0x24] ss:$16 sps:$4 sm:$0xff]   ;;  %v875_v26 = vld [vmem:[%s1163_s1 + $0x2c] ss:$16 sps:$4 sm:$0xff]   ;;  %v877_v27 = vld [vmem:[%s1163_s1 + $0x20] ss:$16 sps:$4 sm:$0xff]  }
   0xa   :  { %v878_v28 = vld [vmem:[%s1163_s1 + $0x28] ss:$16 sps:$4 sm:$0xff]   ;;  %v879_v29 = vld [vmem:[%s1163_s1 + $0x4] ss:$16 sps:$4 sm:$0xff]   ;;  %v881_v30 = vld [vmem:[%s1163_s1 + $0xc] ss:$16 sps:$4 sm:$0xff]  }
   0xb   :  { %226 = vmatpush1.bf16.msra.mxu0 %v853_v11  ;;  %269 = vmatpush1.bf16.msra.mxu1 %v854_v12  ;;  %v883_v31 = vld [vmem:[%s1163_s1] ss:$16 sps:$4 sm:$0xff]   ;;  %v884_v32 = vld [vmem:[%s1163_s1 + $0x8] ss:$16 sps:$4 sm:$0xff]   ;;  %v919_v3 = vmov 1966171168  }
   0xc   :  { %227 = vmatprep.subr.bf16.mxu0 %v855_v13  ;;  %270 = vmatprep.subr.bf16.mxu1 %v857_v14  ;;  %v886_v33 = vld [vmem:[%s1165_s3 + $0x78] sm:$0xff]   ;;  %v885_v34 = vld [vmem:[%s1164_s0] sm:$0xff]   ;;  %v890_v38 = vld [vmem:[%s1165_s3 + $0x70] sm:$0xff]   ;;  %v322_v4 = vunpack.c.l.s4 %v919_v3  ;;  %v325_v7 = vshrl.u32 %v324_v5, 7 }
   0xd   :  { %v887_v35 = vld [vmem:[%s1165_s3 + $0xf8] sm:$0xff]   ;;  %v891_v39 = vld [vmem:[%s1165_s3 + $0xf0] sm:$0xff]   ;;  %v894_v42 = vld [vmem:[%s1165_s3 + $0x68] sm:$0xff]  }
   0xe   :  { %v888_v36 = vld [vmem:[%s1165_s3 + $0x38] sm:$0xff]   ;;  %v892_v40 = vld [vmem:[%s1165_s3 + $0x30] sm:$0xff]   ;;  %v895_v43 = vld [vmem:[%s1165_s3 + $0xe8] sm:$0xff]   ;;  %v323_v6 = vunpack.c.0.s8 %v322_v4 }
   0xf   :  { %228 = vmatpush1.bf16.msra.mxu0 %v859_v15  ;;  %271 = vmatpush1.bf16.msra.mxu1 %v860_v16  ;;  %v889_v37 = vld [vmem:[%s1165_s3 + $0xb8] sm:$0xff]   ;;  %v893_v41 = vld [vmem:[%s1165_s3 + $0xb0] sm:$0xff]   ;;  %v896_v44 = vld [vmem:[%s1165_s3 + $0x28] sm:$0xff]  }
  0x10   :  { %229 = vmatprep.subr.bf16.mxu0 %v861_v17  ;;  %272 = vmatprep.subr.bf16.mxu1 %v863_v18  ;;  %v897_v45 = vld [vmem:[%s1165_s3 + $0xa8] sm:$0xff]   ;;  %v898_v46 = vld [vmem:[%s1165_s3 + $0x60] sm:$0xff]   ;;  %v902_v50 = vld [vmem:[%s1165_s3 + $0x58] sm:$0xff]   ;;  %v326_v9 = vsub.s32 %v323_v6, %v325_v7  ;;  %v342_v18 = vsub.s32 0, %v325_v7 }
  0x11   :  { %v899_v47 = vld [vmem:[%s1165_s3 + $0xe0] sm:$0xff]   ;;  %v903_v51 = vld [vmem:[%s1165_s3 + $0xd8] sm:$0xff]   ;;  %v906_v54 = vld [vmem:[%s1165_s3 + $0x50] sm:$0xff]  }
  0x12   :  { %v900_v48 = vld [vmem:[%s1165_s3 + $0x20] sm:$0xff]   ;;  %v904_v52 = vld [vmem:[%s1165_s3 + $0x18] sm:$0xff]   ;;  %v907_v55 = vld [vmem:[%s1165_s3 + $0xd0] sm:$0xff]  }
  0x13   :  { %230 = vmatpush1.bf16.msra.mxu0 %v865_v19  ;;  %273 = vmatpush1.bf16.msra.mxu1 %v866_v20  ;;  %v901_v49 = vld [vmem:[%s1165_s3 + $0xa0] sm:$0xff]   ;;  %v905_v53 = vld [vmem:[%s1165_s3 + $0x98] sm:$0xff]   ;;  %v908_v56 = vld [vmem:[%s1165_s3 + $0x10] sm:$0xff]  }
  0x14   :  { %231 = vmatprep.subr.bf16.mxu0 %v867_v21  ;;  %274 = vmatprep.subr.bf16.mxu1 %v869_v22  ;;  %v909_v57 = vld [vmem:[%s1165_s3 + $0x90] sm:$0xff]   ;;  %v910_v58 = vld [vmem:[%s1165_s3 + $0x48] sm:$0xff]   ;;  %v914_v62 = vld [vmem:[%s1165_s3 + $0x40] sm:$0xff]  }
  0x15   :  { %v911_v59 = vld [vmem:[%s1165_s3 + $0xc8] sm:$0xff]   ;;  %v915_v63 = vld [vmem:[%s1165_s3 + $0xc0] sm:$0xff]  }
  0x16   :  { %v912_v60 = vld [vmem:[%s1165_s3 + $0x8] sm:$0xff]   ;;  %v916_v0 = vld [vmem:[%s1165_s3] sm:$0xff]  }
  0x17   :  { %232 = vmatpush1.bf16.msra.mxu0 %v871_v23  ;;  %275 = vmatpush1.bf16.msra.mxu1 %v872_v24  ;;  %v913_v61 = vld [vmem:[%s1165_s3 + $0x88] sm:$0xff]   ;;  %v917_v2 = vld [vmem:[%s1165_s3 + $0x80] sm:$0xff]  }
  0x18   :  { %233 = vmatprep.subr.bf16.mxu0 %v873_v25  ;;  %276 = vmatprep.subr.bf16.mxu1 %v875_v26  ;;  %v757_v8 = vld.sshfl [vmem:[%s1166_s2] sm:$0x33 pattern:$0x75316420] }
  0x19   :  { %v320_v10 = vcombine.high %v757_v8, %v757_v8  ;;  %v327_v11 = vrot.slane %v757_v8, %v326_v9 }
  0x1b   :  { %234 = vmatpush1.bf16.msra.mxu0 %v877_v27  ;;  %277 = vmatpush1.bf16.msra.mxu1 %v878_v28  ;;  %v334_v12 = vrot.slane %v320_v10, %v326_v9  ;;  %v335_v13 = vcombine.high %v327_v11, %v327_v11  ;;  %v338_v17 = vpack.i.b16 %v327_v11, %v327_v11 }
  0x1c   :  { %235 = vmatprep.subr.bf16.mxu0 %v879_v29  ;;  %278 = vmatprep.subr.bf16.mxu1 %v881_v30 }
  0x1d   :  { %v336_v14 = vcombine.high %v334_v12, %v334_v12  ;;  %v352_v19 = vpack.i.b16 %v335_v13, %v335_v13  ;;  %v345_v20 = vpack.i.b16 %v334_v12, %v334_v12  ;;  %v343_v25 = vrot.slane %v338_v17, %v342_v18 }
  0x1f   :  { %236 = vmatpush1.bf16.msra.mxu0 %v883_v31  ;;  %279 = vmatpush1.bf16.msra.mxu1 %v884_v32  ;;  %v359_v21 = vpack.i.b16 %v336_v14, %v336_v14  ;;  %v357_v27 = vrot.slane %v352_v19, %v342_v18  ;;  %v350_v30 = vrot.slane %v345_v20, %v342_v18 }
  0x20   :  { %791 = vmatprep.subr.bf16.mxu0 %v886_v33  ;;  %813 = vmatprep.subr.bf16.mxu1 %v887_v35 }
  0x21   :  { %v364_v31 = vrot.slane %v359_v21, %v342_v18 }
  0x22   :  { %254 = vmatmul.mubr.bf16.vlgmr.msra.gmra.mxu0 %v885_v34  ;;  %297 = vmatmul.mubr.bf16.vlgmr.msra.gmra.mxu1 %v885_v34 }
  0x23   :  { %792 = vmatpush3.bf16.msra.mxu0 %v888_v36  ;;  %814 = vmatpush3.bf16.msra.mxu1 %v889_v37 }
  0x24   :  { %793 = vmatprep.subr.bf16.mxu0 %v890_v38  ;;  %815 = vmatprep.subr.bf16.mxu1 %v891_v39 }
  0x27   :  { %794 = vmatpush3.bf16.msra.mxu0 %v892_v40  ;;  %816 = vmatpush3.bf16.msra.mxu1 %v893_v41 }
  0x28   :  { %795 = vmatprep.subr.bf16.mxu0 %v894_v42  ;;  %817 = vmatprep.subr.bf16.mxu1 %v895_v43 }
  0x2b   :  { %796 = vmatpush3.bf16.msra.mxu0 %v896_v44  ;;  %818 = vmatpush3.bf16.msra.mxu1 %v897_v45 }
  0x2c   :  { %797 = vmatprep.subr.bf16.mxu0 %v898_v46  ;;  %819 = vmatprep.subr.bf16.mxu1 %v899_v47  ;;  %v758_v46 = vld [vmem:[%s1167_s4] ss:$0 sm:$0xff] }
  0x2f   :  { %798 = vmatpush3.bf16.msra.mxu0 %v900_v48  ;;  %820 = vmatpush3.bf16.msra.mxu1 %v901_v49 }
  0x30   :  { %799 = vmatprep.subr.bf16.mxu0 %v902_v50  ;;  %821 = vmatprep.subr.bf16.mxu1 %v903_v51 }
  0x33   :  { %800 = vmatpush3.bf16.msra.mxu0 %v904_v52  ;;  %822 = vmatpush3.bf16.msra.mxu1 %v905_v53 }
  0x34   :  { %801 = vmatprep.subr.bf16.mxu0 %v906_v54  ;;  %823 = vmatprep.subr.bf16.mxu1 %v907_v55 }
  0x37   :  { %802 = vmatpush3.bf16.msra.mxu0 %v908_v56  ;;  %824 = vmatpush3.bf16.msra.mxu1 %v909_v57 }
  0x38   :  { %803 = vmatprep.subr.bf16.mxu0 %v910_v58  ;;  %825 = vmatprep.subr.bf16.mxu1 %v911_v59 }
  0x3b   :  { %804 = vmatpush3.bf16.msra.mxu0 %v912_v60  ;;  %826 = vmatpush3.bf16.msra.mxu1 %v913_v61 }
  0x3c   :  { %805 = vmatprep.subr.bf16.mxu0 %v914_v62  ;;  %827 = vmatprep.subr.bf16.mxu1 %v915_v63 }
  0x3f   :  { %806 = vmatpush3.bf16.msra.mxu0 %v916_v0  ;;  %828 = vmatpush3.bf16.msra.mxu1 %v917_v2 }
  0xe2   :  { %v255_v15 = vpop.f32.mrf.mxu0  ;;  %v298_v16 = vpop.f32.mrf.mxu1 }
  0xe4   :  { %v257_v22 = vpop.f32.mrf.mxu0  ;;  %v300_v23 = vpop.f32.mrf.mxu1 }
  0xe6   :  { %v259_v24 = vpop.f32.mrf.mxu0  ;;  %v302_v26 = vpop.f32.mrf.mxu1 }
  0xe7   :  { %v308_v28 = vpack.c.bf16 %v259_v24, %v255_v15  ;;  %v310_v29 = vpack.c.bf16 %v302_v26, %v298_v16 }
  0xe8   :  { %v261_v32 = vpop.f32.mrf.mxu0  ;;  %v304_v33 = vpop.f32.mrf.mxu1 }
  0xe9   :  { %v309_v34 = vpack.c.bf16 %v261_v32, %v257_v22  ;;  %v311_v35 = vpack.c.bf16 %v304_v33, %v300_v23  ;;  %v365_v36 = vadd.bf16 %v343_v25, %v308_v28  ;;  %v367_v37 = vadd.bf16 %v357_v27, %v310_v29 }
  0xeb   :  { %v366_v38 = vadd.bf16 %v350_v30, %v309_v34  ;;  %v368_v39 = vadd.bf16 %v364_v31, %v311_v35  ;;  %v369_v42 = vmax.bf16 %v918_v1, %v365_v36  ;;  %v371_v43 = vmax.bf16 %v918_v1, %v367_v37 }
  0xed   :  { %v370_v40 = vmax.bf16 %v918_v1, %v366_v38  ;;  %v372_v41 = vmax.bf16 %v918_v1, %v368_v39 }
  0xef   :  { %668 = vmatprep.mubr.bf16.mxu0 %v370_v40  ;;  %709 = vmatprep.mubr.bf16.mxu1 %v372_v41 }
  0xf0   :  { %669 = vmatmul.mubr.bf16.vlgmr.msra.gmra.mxu0 %v369_v42  ;;  %710 = vmatmul.mubr.bf16.vlgmr.msra.gmra.mxu1 %v371_v43 }
 0x1b0   :  { %v807_v44 = vpop.f32.mrf.mxu0  ;;  %v829_v45 = vpop.f32.mrf.mxu1 }
 0x1b2   :  { %v808_v47 = vpop.f32.mrf.mxu0  ;;  %v830_v48 = vpop.f32.mrf.mxu1 }
 0x1b3   :  { %v809_v49 = vadd.f32 %v808_v47, %v807_v44  ;;  %v831_v53 = vadd.f32 %v830_v48, %v829_v45 }
 0x1b4   :  { %v810_v50 = vpop.f32.mrf.mxu0  ;;  %v832_v51 = vpop.f32.mrf.mxu1 }
 0x1b5   :  { %v671_v52 = vadd.f32 %v809_v49, %v758_v46 }
 0x1b6   :  { %v811_v54 = vpop.f32.mrf.mxu0  ;;  %v833_v55 = vpop.f32.mrf.mxu1 }
 0x1b7   :  { %v712_v1 = vadd.f32 %v831_v53, %v671_v52  ;;  %v812_v56 = vadd.f32 %v811_v54, %v810_v50  ;;  %v834_v58 = vadd.f32 %v833_v55, %v832_v51 }
 0x1b9   :  { %718 = vst [vmem:[%s1168_s5] sm:$0xff] %v712_v1  ;;  %v674_v57 = vadd.f32 %v812_v56, %v758_v46 }
 0x1bb   :  { %v715_v59 = vadd.f32 %v834_v58, %v674_v57 }
 0x1bd   :  { %719 = vst [vmem:[%s1168_s5 + $0x8] sm:$0xff] %v715_v59 }

</bundles_post_ra>
